<compile_context>
chip_gen: v7x
topology: tpu7x:2x2x1
jax: 0.10.0
libtpu: 0.0.40
codegen_flags: <defaults>
</compile_context>

<pallas_src>
import jax
import jax.numpy as jnp
from jax.experimental import pallas as pl
from jax.experimental.pallas import tpu as pltpu


def _leaky_relu(x, slope=0.2):
    return jnp.where(x > 0, x, slope * x)


def discriminator_kernel(x_ref, w0_ref, b0_ref, w1_ref, b1_ref,
                         w2_ref, b2_ref, o_ref):
    # One batch tile per grid step; all (tiny) weights resident in VMEM.
    # Matmul operands bf16 (MXU), accumulate f32, elementwise f32 (VPU).
    x = x_ref[...]                                            # (tm, D) f32

    # linear_0 + LeakyReLU(0.2)      (dropout_0 == identity in eval)
    h = jnp.dot(x.astype(jnp.bfloat16), w0_ref[...],
                preferred_element_type=jnp.float32) + b0_ref[...]
    h = _leaky_relu(h)

    # linear_1 + LeakyReLU(0.2)      (dropout_1 == identity in eval)
    h = jnp.dot(h.astype(jnp.bfloat16), w1_ref[...],
                preferred_element_type=jnp.float32) + b1_ref[...]
    h = _leaky_relu(h)

    # pred (lane-padded to A_pad columns; wrapper slices back to n_atlas)
    out = jnp.dot(h.astype(jnp.bfloat16), w2_ref[...],
                  preferred_element_type=jnp.float32) + b2_ref[...]
    o_ref[...] = out.astype(o_ref.dtype)


def discriminator_forward(x, params, *, tm=256):
    """x: (B, latent_dim) float32.  params: dict of w0,b0,w1,b1,w2,b2 (f32)."""
    B, D = x.shape
    H = params["w0"].shape[1]          # 256
    A = params["w2"].shape[1]          # n_atlas

    # Lane-dense output: pad output columns up to a multiple of 128.
    A_pad = max(128, pl.cdiv(A, 128) * 128)

    # Batch tile: cap at the (sublane-rounded) batch so tiny batches still run
    # with a single grid step; pad batch rows with zeros to a tile multiple.
    tm_eff = min(tm, max(8, pl.cdiv(B, 8) * 8))
    B_pad = pl.cdiv(B, tm_eff) * tm_eff
    xp = x if B_pad == B else jnp.pad(x, ((0, B_pad - B), (0, 0)))

    # bf16 weights (MXU operands), f32 biases (VPU adds), zero-pad pred cols.
    w0 = params["w0"].astype(jnp.bfloat16)
    w1 = params["w1"].astype(jnp.bfloat16)
    w2 = jnp.pad(params["w2"], ((0, 0), (0, A_pad - A))).astype(jnp.bfloat16)
    b0 = params["b0"].astype(jnp.float32)
    b1 = params["b1"].astype(jnp.float32)
    b2 = jnp.pad(params["b2"], ((0, 0), (0, A_pad - A))).astype(jnp.float32)

    grid = (B_pad // tm_eff,)

    in_specs = [
        pl.BlockSpec((tm_eff, D), lambda i: (i, 0)),    # x batch tile
        pl.BlockSpec((D, H), lambda i: (0, 0)),         # w0 (grid-invariant)
        pl.BlockSpec((1, H), lambda i: (0, 0)),         # b0
        pl.BlockSpec((H, H), lambda i: (0, 0)),         # w1
        pl.BlockSpec((1, H), lambda i: (0, 0)),         # b1
        pl.BlockSpec((H, A_pad), lambda i: (0, 0)),     # w2 (lane-padded)
        pl.BlockSpec((1, A_pad), lambda i: (0, 0)),     # b2
    ]
    out_spec = pl.BlockSpec((tm_eff, A_pad), lambda i: (i, 0))

    out = pl.pallas_call(
        discriminator_kernel,
        out_shape=jax.ShapeDtypeStruct((B_pad, A_pad), x.dtype),
        grid_spec=pltpu.PrefetchScalarGridSpec(
            num_scalar_prefetch=0,
            grid=grid,
            in_specs=in_specs,
            out_specs=out_spec,
        ),
        compiler_params=pltpu.CompilerParams(
            dimension_semantics=("parallel",)),
    )(xp, w0, b0, w1, b1, w2, b2)

    return out[:B, :A]


def init_params(key, latent_dim, n_atlas, hidden=256, dtype=jnp.float32):
    """Deterministic synthetic init (Kaiming-uniform-like scale)."""
    ks = jax.random.split(key, 6)

    def lin(kw, kb, fan_in, fan_out):
        bound = 1.0 / jnp.sqrt(fan_in)
        w = jax.random.uniform(kw, (fan_in, fan_out), dtype, -bound, bound)
        b = jax.random.uniform(kb, (1, fan_out), dtype, -bound, bound)
        return w, b

    w0, b0 = lin(ks[0], ks[1], latent_dim, hidden)
    w1, b1 = lin(ks[2], ks[3], hidden, hidden)
    w2, b2 = lin(ks[4], ks[5], hidden, n_atlas)
    return dict(w0=w0, b0=b0, w1=w1, b1=b1, w2=w2, b2=b2)


def discriminator_ref(x, p):
    """Pure-JAX reference mirroring the kernel's bf16-operand / f32-acc math."""
    def lin(h, w, b):
        return jnp.dot(h.astype(jnp.bfloat16), w.astype(jnp.bfloat16),
                       preferred_element_type=jnp.float32) + b
    h = _leaky_relu(lin(x, p["w0"], p["b0"]))
    h = _leaky_relu(lin(h, p["w1"], p["b1"]))
    return lin(h, p["w2"], p["b2"])


if __name__ == "__main__":
    latent_dim, n_atlas, batch = 32, 4, 10   # batch=10 exercises the pad path

    key = jax.random.PRNGKey(0)
    k_x, k_p = jax.random.split(key)
    x = jax.random.normal(k_x, (batch, latent_dim), dtype=jnp.float32)
    params = init_params(k_p, latent_dim, n_atlas)

    out = discriminator_forward(x, params)
    out = jax.block_until_ready(out)

    ref = discriminator_ref(x, params)
    assert out.shape == (batch, n_atlas), out.shape
    assert jnp.allclose(out, ref, atol=1e-2, rtol=1e-2), "mismatch vs JAX reference"

    print("KERNEL_OK")
</pallas_src>

<mosaic_0001>
module attributes {stable_mosaic.version = 11 : i64} {
  func.func @discriminator_kernel(%arg0: i32, %arg1: memref<16x32xf32, #tpu.memory_space<vmem>>, %arg2: memref<32x256xbf16, #tpu.memory_space<vmem>>, %arg3: memref<1x256xf32, #tpu.memory_space<vmem>>, %arg4: memref<256x256xbf16, #tpu.memory_space<vmem>>, %arg5: memref<1x256xf32, #tpu.memory_space<vmem>>, %arg6: memref<256x128xbf16, #tpu.memory_space<vmem>>, %arg7: memref<1x128xf32, #tpu.memory_space<vmem>>, %arg8: memref<16x128xf32, #tpu.memory_space<vmem>>) attributes {dimension_semantics = [#tpu.dimension_semantics<parallel>], iteration_bounds = array<i64: 1>, scalar_prefetch = 0 : i64, scratch_operands = 0 : i64, tpu.core_type = #tpu.core_type<tc>, window_params = [{transform_indices = @transform_0, window_bounds = array<i64: 16, 32>}, {pipeline_mode = #tpu.pipeline_mode<synchronous>, transform_indices = @transform_1, window_bounds = array<i64: 32, 256>}, {pipeline_mode = #tpu.pipeline_mode<synchronous>, transform_indices = @transform_2, window_bounds = array<i64: 1, 256>}, {pipeline_mode = #tpu.pipeline_mode<synchronous>, transform_indices = @transform_3, window_bounds = array<i64: 256, 256>}, {pipeline_mode = #tpu.pipeline_mode<synchronous>, transform_indices = @transform_4, window_bounds = array<i64: 1, 256>}, {pipeline_mode = #tpu.pipeline_mode<synchronous>, transform_indices = @transform_5, window_bounds = array<i64: 256, 128>}, {pipeline_mode = #tpu.pipeline_mode<synchronous>, transform_indices = @transform_6, window_bounds = array<i64: 1, 128>}, {transform_indices = @transform_7, window_bounds = array<i64: 16, 128>}]} {
    %c0 = arith.constant 0 : index
    %c0_0 = arith.constant 0 : index
    %0 = vector.load %arg1[%c0, %c0_0] : memref<16x32xf32, #tpu.memory_space<vmem>>, vector<16x32xf32>
    %1 = arith.truncf %0 : vector<16x32xf32> to vector<16x32xbf16>
    %c0_1 = arith.constant 0 : index
    %c0_2 = arith.constant 0 : index
    %2 = vector.load %arg2[%c0_1, %c0_2] : memref<32x256xbf16, #tpu.memory_space<vmem>>, vector<32x256xbf16>
    %cst = arith.constant dense<0.000000e+00> : vector<16x256xf32>
    %3 = tpu.matmul %1, %2, %cst {dimension_numbers = #tpu.dot_dimension_numbers<[1], [0], [0], [1], [0, 0, 1, 1], [], []>} : vector<16x32xbf16>, vector<32x256xbf16>, vector<16x256xf32> -> vector<16x256xf32>
    %c0_3 = arith.constant 0 : index
    %c0_4 = arith.constant 0 : index
    %4 = vector.load %arg3[%c0_3, %c0_4] : memref<1x256xf32, #tpu.memory_space<vmem>>, vector<1x256xf32>
    %5 = vector.broadcast %4 : vector<1x256xf32> to vector<16x256xf32>
    %6 = arith.addf %3, %5 : vector<16x256xf32>
    %cst_5 = arith.constant 0.000000e+00 : f32
    %7 = vector.broadcast %cst_5 : f32 to vector<16x256xf32>
    %8 = arith.cmpf ogt, %6, %7 : vector<16x256xf32>
    %cst_6 = arith.constant 2.000000e-01 : f32
    %9 = vector.broadcast %cst_6 : f32 to vector<16x256xf32>
    %10 = arith.mulf %9, %6 : vector<16x256xf32>
    %11 = arith.select %8, %6, %10 : vector<16x256xi1>, vector<16x256xf32>
    %12 = arith.truncf %11 : vector<16x256xf32> to vector<16x256xbf16>
    %c0_7 = arith.constant 0 : index
    %c0_8 = arith.constant 0 : index
    %13 = vector.load %arg4[%c0_7, %c0_8] : memref<256x256xbf16, #tpu.memory_space<vmem>>, vector<256x256xbf16>
    %cst_9 = arith.constant dense<0.000000e+00> : vector<16x256xf32>
    %14 = tpu.matmul %12, %13, %cst_9 {dimension_numbers = #tpu.dot_dimension_numbers<[1], [0], [0], [1], [0, 0, 1, 1], [], []>} : vector<16x256xbf16>, vector<256x256xbf16>, vector<16x256xf32> -> vector<16x256xf32>
    %c0_10 = arith.constant 0 : index
    %c0_11 = arith.constant 0 : index
    %15 = vector.load %arg5[%c0_10, %c0_11] : memref<1x256xf32, #tpu.memory_space<vmem>>, vector<1x256xf32>
    %16 = vector.broadcast %15 : vector<1x256xf32> to vector<16x256xf32>
    %17 = arith.addf %14, %16 : vector<16x256xf32>
    %cst_12 = arith.constant 0.000000e+00 : f32
    %18 = vector.broadcast %cst_12 : f32 to vector<16x256xf32>
    %19 = arith.cmpf ogt, %17, %18 : vector<16x256xf32>
    %cst_13 = arith.constant 2.000000e-01 : f32
    %20 = vector.broadcast %cst_13 : f32 to vector<16x256xf32>
    %21 = arith.mulf %20, %17 : vector<16x256xf32>
    %22 = arith.select %19, %17, %21 : vector<16x256xi1>, vector<16x256xf32>
    %23 = arith.truncf %22 : vector<16x256xf32> to vector<16x256xbf16>
    %c0_14 = arith.constant 0 : index
    %c0_15 = arith.constant 0 : index
    %24 = vector.load %arg6[%c0_14, %c0_15] : memref<256x128xbf16, #tpu.memory_space<vmem>>, vector<256x128xbf16>
    %cst_16 = arith.constant dense<0.000000e+00> : vector<16x128xf32>
    %25 = tpu.matmul %23, %24, %cst_16 {dimension_numbers = #tpu.dot_dimension_numbers<[1], [0], [0], [1], [0, 0, 1, 1], [], []>} : vector<16x256xbf16>, vector<256x128xbf16>, vector<16x128xf32> -> vector<16x128xf32>
    %c0_17 = arith.constant 0 : index
    %c0_18 = arith.constant 0 : index
    %26 = vector.load %arg7[%c0_17, %c0_18] : memref<1x128xf32, #tpu.memory_space<vmem>>, vector<1x128xf32>
    %27 = vector.broadcast %26 : vector<1x128xf32> to vector<16x128xf32>
    %28 = arith.addf %25, %27 : vector<16x128xf32>
    %c0_19 = arith.constant 0 : index
    %c0_20 = arith.constant 0 : index
    %29 = vector.load %arg8[%c0_19, %c0_20] : memref<16x128xf32, #tpu.memory_space<vmem>>, vector<16x128xf32>
    tpu.vector_store %arg8[%c0_19, %c0_20], %28 {strides = array<i32>} : memref<16x128xf32, #tpu.memory_space<vmem>>, vector<16x128xf32>,
    return
  }
  func.func @transform_0(%arg0: i32) -> (i32, i32) {
    %c0_i32 = arith.constant 0 : i32
    %c0_i32_0 = arith.constant 0 : i32
    return %arg0, %c0_i32 : i32, i32
  }
  func.func @transform_1(%arg0: i32) -> (i32, i32) {
    %c0_i32 = arith.constant 0 : i32
    %c0_i32_0 = arith.constant 0 : i32
    %c0_i32_1 = arith.constant 0 : i32
    return %c0_i32, %c0_i32_0 : i32, i32
  }
  func.func @transform_2(%arg0: i32) -> (i32, i32) {
    %c0_i32 = arith.constant 0 : i32
    %c0_i32_0 = arith.constant 0 : i32
    %c0_i32_1 = arith.constant 0 : i32
    return %c0_i32, %c0_i32_0 : i32, i32
  }
  func.func @transform_3(%arg0: i32) -> (i32, i32) {
    %c0_i32 = arith.constant 0 : i32
    %c0_i32_0 = arith.constant 0 : i32
    %c0_i32_1 = arith.constant 0 : i32
    return %c0_i32, %c0_i32_0 : i32, i32
  }
  func.func @transform_4(%arg0: i32) -> (i32, i32) {
    %c0_i32 = arith.constant 0 : i32
    %c0_i32_0 = arith.constant 0 : i32
    %c0_i32_1 = arith.constant 0 : i32
    return %c0_i32, %c0_i32_0 : i32, i32
  }
  func.func @transform_5(%arg0: i32) -> (i32, i32) {
    %c0_i32 = arith.constant 0 : i32
    %c0_i32_0 = arith.constant 0 : i32
    %c0_i32_1 = arith.constant 0 : i32
    return %c0_i32, %c0_i32_0 : i32, i32
  }
  func.func @transform_6(%arg0: i32) -> (i32, i32) {
    %c0_i32 = arith.constant 0 : i32
    %c0_i32_0 = arith.constant 0 : i32
    %c0_i32_1 = arith.constant 0 : i32
    return %c0_i32, %c0_i32_0 : i32, i32
  }
  func.func @transform_7(%arg0: i32) -> (i32, i32) {
    %c0_i32 = arith.constant 0 : i32
    %c0_i32_0 = arith.constant 0 : i32
    return %arg0, %c0_i32 : i32, i32
  }
}

</mosaic_0001>

<bundles_post_ra>
// kernel: tpu_custom_call.1
= control target key start
LH: loop header
LB: loop body
LE: loop exit
PB: predicated region body
PF: predicated region fallthrough
CT: control target
= control target key end

     0   :  { %12 = vsyncpa [#allocation3], 0  ;;  %s1060_s0 = inlined_call_operand.hbm [shape: f32[16,32], index: 0, kind: input, shape index: {}]   ;;  %s1061_s1 = inlined_call_operand.hbm [shape: bf16[32,256], index: 1, kind: input, shape index: {}]   ;;  %s1062_s2 = inlined_call_operand.vmem [shape: f32[1,256], index: 2, kind: input, shape index: {}]   ;;  %s1063_s3 = inlined_call_operand.hbm [shape: bf16[256,256], index: 3, kind: input, shape index: {}]   ;;  %s1064_s4 = inlined_call_operand.vmem [shape: f32[1,256], index: 4, kind: input, shape index: {}]   ;;  %s1065_s5 = inlined_call_operand.hbm [shape: bf16[256,128], index: 5, kind: input, shape index: {}]   ;;  %s1066_s6 = inlined_call_operand.vmem [shape: f32[1,128], index: 6, kind: input, shape index: {}]   ;;  %s1067_s7 = inlined_call_operand.hbm [shape: f32[16,128], index: 7, kind: output, shape index: {}]  }
   0x1   :  { %13 = vsyncpa [#allocation6], 0 }
   0x2   :  { %14 = vsyncpa [#allocation9], 0 }
   0x3   :  { %15 = vsyncpa [#allocation4], 0  ;;  %s915_s24 = smov [#allocation5]   ;;  %s916_s26 = smov [#allocation2]  }
   0x4   :  { %s33_s25 = sshll.u32 %s915_s24, 4  ;;  %s21_s27 = sshll.u32 %s916_s26, 4  ;;  %s34_s25 = int_to_ptr.vmem [resolvable:$true] %s33_s25  ;;  %s965_s27 = int_to_ptr.vmem [resolvable:$true] %s21_s27 }
   0x5   :  { %s797_s30 = scalar_lea.hbm %s1061_s1, 512 }
   0x6   :  { %p798_p0 = scmp.ne.s32.totalorder %s1061_s1, %s797_s30  ;;  %p801_p1 = scmp.lt.u32.totalorder %s797_s30, %s1061_s1 }
   0x8   :  { %p803_p2 = pnand %p801_p1, %p798_p0 }
   0xa   :  { %806 = shalt.err (!%p803_p2)
}
   0xb   :  { %s807_s12 = scalar_lea.vmem %s34_s25, 512  ;;  %p812_p4 = scmp.lt.s32.totalorder %s34_s25, %s34_s25 }
   0xc   :  { %p808_p3 = scmp.ne.s32.totalorder %s34_s25, %s807_s12  ;;  %p813_p5 = scmp.lt.s32.totalorder %s807_s12, %s807_s12 }
   0xe   :  { %p814_p6 = por %p813_p5, %p812_p4 }
  0x10   :  { %p815_p7 = pnand %p814_p6, %p808_p3 }
  0x12   :  { %818 = shalt.err (!%p815_p7)
}
  0x13   :  { %s917_s13 = smov 128   ;;  %s918_s14 = smov 8  }
  0x14   :  { %39 = dma.hbm_to_vmem [thread:$0]  %s1061_s1, 512, %s34_s25, [#allocation6], %s917_s13, %s917_s13, %s918_s14  }
  0x15   :  { %s819_s19 = scalar_lea.hbm %s1060_s0, 256 }
  0x16   :  { %p820_p8 = scmp.ne.s32.totalorder %s1060_s0, %s819_s19  ;;  %p823_p9 = scmp.lt.u32.totalorder %s819_s19, %s1060_s0 }
  0x18   :  { %p825_p10 = pnand %p823_p9, %p820_p8 }
  0x1a   :  { %828 = shalt.err (!%p825_p10)
}
  0x1b   :  { %s829_s24 = scalar_lea.vmem %s965_s27, 256  ;;  %p834_p12 = scmp.lt.s32.totalorder %s965_s27, %s965_s27 }
  0x1c   :  { %p830_p11 = scmp.ne.s32.totalorder %s965_s27, %s829_s24  ;;  %p835_p13 = scmp.lt.s32.totalorder %s829_s24, %s829_s24 }
  0x1e   :  { %p836_p0 = por %p835_p13, %p834_p12 }
  0x20   :  { %p837_p1 = pnand %p836_p0, %p830_p11 }
  0x22   :  { %840 = shalt.err (!%p837_p1)
}
  0x23   :  { %27 = dma.hbm_to_vmem [thread:$0]  %s1060_s0, 256, %s965_s27, [#allocation3], %s917_s13, %s917_s13, %s918_s14  }
  0x24   :  { %s919_s26 = smov [#allocation7]   ;;  %s920_s29 = smov [#allocation8]  }
  0x25   :  { %s47_s28 = sshll.u32 %s919_s26, 4  ;;  %s61_s30 = sshll.u32 %s920_s29, 4  ;;  %s48_s28 = int_to_ptr.vmem [resolvable:$true] %s47_s28  ;;  %s1002_s30 = int_to_ptr.vmem [resolvable:$true] %s61_s30 }
  0x26   :  { %s841_s10 = scalar_lea.hbm %s1063_s3, 4096 }
  0x27   :  { %p842_p2 = scmp.ne.s32.totalorder %s1063_s3, %s841_s10  ;;  %p845_p3 = scmp.lt.u32.totalorder %s841_s10, %s1063_s3 }
  0x29   :  { %p847_p4 = pnand %p845_p3, %p842_p2 }
  0x2b   :  { %850 = shalt.err (!%p847_p4)
}
  0x2c   :  { %s851_s0 = scalar_lea.vmem %s48_s28, 4096  ;;  %p856_p6 = scmp.lt.s32.totalorder %s48_s28, %s48_s28 }
  0x2d   :  { %p852_p5 = scmp.ne.s32.totalorder %s48_s28, %s851_s0  ;;  %p857_p7 = scmp.lt.s32.totalorder %s851_s0, %s851_s0 }
  0x2f   :  { %p858_p8 = por %p857_p7, %p856_p6 }
  0x31   :  { %p859_p9 = pnand %p858_p8, %p852_p5 }
  0x33   :  { %862 = shalt.err (!%p859_p9)
}
  0x34   :  { %53 = dma.hbm_to_vmem [thread:$0]  %s1063_s3, 4096, %s48_s28, [#allocation6], %s917_s13, %s917_s13, %s918_s14  }
  0x35   :  { %s863_s20 = scalar_lea.hbm %s1065_s5, 2048 }
  0x36   :  { %p864_p10 = scmp.ne.s32.totalorder %s1065_s5, %s863_s20  ;;  %p867_p11 = scmp.lt.u32.totalorder %s863_s20, %s1065_s5 }
  0x38   :  { %p869_p12 = pnand %p867_p11, %p864_p10 }
  0x3a   :  { %872 = shalt.err (!%p869_p12)
}
  0x3b   :  { %s873_s1 = scalar_lea.vmem %s1002_s30, 2048  ;;  %p878_p0 = scmp.lt.s32.totalorder %s1002_s30, %s1002_s30 }
  0x3c   :  { %p874_p13 = scmp.ne.s32.totalorder %s1002_s30, %s873_s1  ;;  %p879_p1 = scmp.lt.s32.totalorder %s873_s1, %s873_s1 }
  0x3e   :  { %p880_p2 = por %p879_p1, %p878_p0 }
  0x40   :  { %p881_p3 = pnand %p880_p2, %p874_p13 }
  0x42   :  { %884 = shalt.err (!%p881_p3)
}
  0x43   :  { %s921_s3 = smov 64   ;;  %s922_s25 = smov 4  }
  0x44   :  { %67 = dma.hbm_to_vmem [thread:$0]  %s1065_s5, 2048, %s1002_s30, [#allocation9], %s921_s3, %s921_s3, %s922_s25  }
  0x45   :  { %907 = dma.done.wait [#allocation3], 256  }
  0x46   :  { %908 = vsyncadd [#allocation3], 4294967040 }
  0x47   :  { %909 = dma.done.wait [#allocation6], 4608  }
  0x48   :  { %910 = vsyncadd [#allocation6], 4294962688 }
  0x49   :  { %911 = dma.done.wait [#allocation9], 2048  }
  0x4a   :  { %912 = vsyncadd [#allocation9], 4294965248  ;;  %v923_v0 = vmov 0   ;;  %v727_v1 = vld [vmem:[#allocation5 + $0x4] ss:$8 sps:$4 sm:$0xff]   ;;  %v83_v5 = vld [vmem:[#allocation2] sm:$0xff]  ;;  %v92_v50 = vlaneseq }
  0x4b   :  { %158 = vmatprep.mubr.bf16.mxu0 %v923_v0  ;;  %v729_v2 = vld [vmem:[#allocation5] ss:$8 sps:$4 sm:$0xff]   ;;  %126 = vmatprep.subr.bf16.mxu0 %v727_v1  ;;  %v730_v3 = vld [vmem:[#allocation5 + $0x14] ss:$8 sps:$4 sm:$0xff]   ;;  %v732_v4 = vld [vmem:[#allocation5 + $0x10] ss:$8 sps:$4 sm:$0xff]  }
  0x4c   :  { %127 = vmatpush1.bf16.msra.mxu0 %v729_v2  ;;  %v84_v6 = vld [vmem:[#allocation2 + $0x8] sm:$0xff]  ;;  %v733_v7 = vld [vmem:[#allocation7 + $0x4] ss:$8 sps:$4 sm:$0xff]   ;;  %v735_v8 = vld [vmem:[#allocation7] ss:$8 sps:$4 sm:$0xff]   ;;  %vm122_vm0 = vcmask 261120  }
  0x4d   :  { %128 = vmatprep.subr.bf16.mxu0 %v730_v3  ;;  %v736_v9 = vld [vmem:[#allocation7 + $0x14] ss:$8 sps:$4 sm:$0xff]   ;;  %v85_v10 = vpack.c.bf16 %v84_v6, %v83_v5  ;;  %387 = vmatprep.subr.bf16.mxu1 %v733_v7  ;;  %v738_v11 = vld [vmem:[#allocation7 + $0x10] ss:$8 sps:$4 sm:$0xff]   ;;  %v739_v12 = vld [vmem:[#allocation7 + $0x24] ss:$8 sps:$4 sm:$0xff]  }
  0x4e   :  { %388 = vmatpush1.bf16.msra.mxu1 %v735_v8  ;;  %v741_v13 = vld [vmem:[#allocation7 + $0x20] ss:$8 sps:$4 sm:$0xff]   ;;  %v742_v14 = vld [vmem:[#allocation7 + $0x34] ss:$8 sps:$4 sm:$0xff]   ;;  %v744_v15 = vld [vmem:[#allocation7 + $0x30] ss:$8 sps:$4 sm:$0xff]  }
  0x4f   :  { %389 = vmatprep.subr.bf16.mxu1 %v736_v9  ;;  %v745_v16 = vld [vmem:[#allocation7 + $0x44] ss:$8 sps:$4 sm:$0xff]   ;;  %v747_v17 = vld [vmem:[#allocation7 + $0x40] ss:$8 sps:$4 sm:$0xff]   ;;  %v748_v18 = vld [vmem:[#allocation7 + $0x54] ss:$8 sps:$4 sm:$0xff]  }
  0x50   :  { %129 = vmatpush1.bf16.msra.mxu0 %v732_v4  ;;  %v750_v19 = vld [vmem:[#allocation7 + $0x50] ss:$8 sps:$4 sm:$0xff]   ;;  %v751_v20 = vld [vmem:[#allocation7 + $0x64] ss:$8 sps:$4 sm:$0xff]   ;;  %v753_v21 = vld [vmem:[#allocation7 + $0x60] ss:$8 sps:$4 sm:$0xff]  }
  0x51   :  { %v754_v22 = vld [vmem:[#allocation7 + $0x74] ss:$8 sps:$4 sm:$0xff]   ;;  %v756_v23 = vld [vmem:[#allocation7 + $0x70] ss:$8 sps:$4 sm:$0xff]   ;;  %v757_v24 = vld [vmem:[#allocation7 + $0x84] ss:$8 sps:$4 sm:$0xff]  }
  0x52   :  { %390 = vmatpush1.bf16.msra.mxu1 %v738_v11  ;;  %v759_v25 = vld [vmem:[#allocation7 + $0x80] ss:$8 sps:$4 sm:$0xff]   ;;  %v760_v26 = vld [vmem:[#allocation7 + $0x94] ss:$8 sps:$4 sm:$0xff]   ;;  %v762_v27 = vld [vmem:[#allocation7 + $0x90] ss:$8 sps:$4 sm:$0xff]  }
  0x53   :  { %645 = vmatmul.mubr.msk.bf16.vlgmr.msra.gmra.mrb[0].mxu0 %vm122_vm0, %v85_v10  ;;  %391 = vmatprep.subr.bf16.mxu1 %v739_v12  ;;  %v763_v28 = vld [vmem:[#allocation7 + $0xa4] ss:$8 sps:$4 sm:$0xff]   ;;  %v765_v29 = vld [vmem:[#allocation7 + $0xa0] ss:$8 sps:$4 sm:$0xff]   ;;  %v766_v30 = vld [vmem:[#allocation7 + $0xb4] ss:$8 sps:$4 sm:$0xff]  }
  0x54   :  { %v768_v31 = vld [vmem:[#allocation7 + $0xb0] ss:$8 sps:$4 sm:$0xff]   ;;  %v769_v32 = vld [vmem:[#allocation7 + $0xc4] ss:$8 sps:$4 sm:$0xff]   ;;  %v771_v33 = vld [vmem:[#allocation7 + $0xc0] ss:$8 sps:$4 sm:$0xff]  }
  0x55   :  { %v772_v34 = vld [vmem:[#allocation7 + $0xd4] ss:$8 sps:$4 sm:$0xff]   ;;  %v774_v35 = vld [vmem:[#allocation7 + $0xd0] ss:$8 sps:$4 sm:$0xff]   ;;  %v775_v36 = vld [vmem:[#allocation7 + $0xe4] ss:$8 sps:$4 sm:$0xff]  }
  0x56   :  { %392 = vmatpush1.bf16.msra.mxu1 %v741_v13  ;;  %v777_v37 = vld [vmem:[#allocation7 + $0xe0] ss:$8 sps:$4 sm:$0xff]   ;;  %v778_v38 = vld [vmem:[#allocation7 + $0xf4] ss:$8 sps:$4 sm:$0xff]   ;;  %v780_v39 = vld [vmem:[#allocation7 + $0xf0] ss:$8 sps:$4 sm:$0xff]  }
  0x57   :  { %393 = vmatprep.subr.bf16.mxu1 %v742_v14  ;;  %v781_v40 = vld [vmem:[#allocation8 + $0x40] sm:$0xff]   ;;  %v783_v42 = vld [vmem:[#allocation8 + $0x48] sm:$0xff]   ;;  %v785_v44 = vld [vmem:[#allocation8 + $0x50] sm:$0xff]   ;;  %v93_v51 = vshrl.u32 %v92_v50, 7  ;;  %s924_s9 = smov [#allocation10]  }
  0x58   :  { %v782_v41 = vld [vmem:[#allocation8] sm:$0xff]   ;;  %695 = vmatprep.subr.bf16.mxu0 %v781_v40  ;;  %v784_v43 = vld [vmem:[#allocation8 + $0x8] sm:$0xff]   ;;  %v786_v45 = vld [vmem:[#allocation8 + $0x10] sm:$0xff]   ;;  %s627_s10 = sshll.u32 %s924_s9, 4  ;;  %s628_s10 = int_to_ptr.vmem [resolvable:$true] %s627_s10 }
  0x59   :  { %696 = vmatpush3.bf16.msra.mxu0 %v782_v41  ;;  %v787_v46 = vld [vmem:[#allocation8 + $0x58] sm:$0xff]   ;;  %v789_v48 = vld [vmem:[#allocation8 + $0x60] sm:$0xff]   ;;  %v94_v52 = vsub.s32 0, %v93_v51  ;;  %v90_v53 = vld [vmem:[%s1062_s2] sm:$0x3]  ;;  %v98_v54 = vsub.s32 1, %v93_v51  ;;  %p890_p5 = scmp.lt.s32.totalorder %s628_s10, %s628_s10 }
  0x5a   :  { %394 = vmatpush1.bf16.msra.mxu1 %v744_v15  ;;  %697 = vmatprep.subr.bf16.mxu0 %v783_v42  ;;  %v788_v47 = vld [vmem:[#allocation8 + $0x18] sm:$0xff]   ;;  %v790_v49 = vld [vmem:[#allocation8 + $0x20] sm:$0xff]   ;;  %v791_v11 = vld [vmem:[#allocation8 + $0x68] sm:$0xff]   ;;  %s885_s11 = scalar_lea.vmem %s628_s10, 256 }
  0x5b   :  { %395 = vmatprep.subr.bf16.mxu1 %v745_v16  ;;  %v95_v55 = vrot.slane %v90_v53, %v94_v52  ;;  %v99_v56 = vrot.slane %v90_v53, %v98_v54  ;;  %v792_v12 = vld [vmem:[#allocation8 + $0x28] sm:$0xff]   ;;  %v793_v13 = vld [vmem:[#allocation8 + $0x70] sm:$0xff]   ;;  %v795_v15 = vld [vmem:[#allocation8 + $0x78] sm:$0xff]   ;;  %p886_p4 = scmp.ne.s32.totalorder %s628_s10, %s885_s11  ;;  %p891_p6 = scmp.lt.s32.totalorder %s885_s11, %s885_s11 }
  0x5c   :  { %v794_v14 = vld [vmem:[#allocation8 + $0x30] sm:$0xff]   ;;  %v796_v16 = vld [vmem:[#allocation8 + $0x38] sm:$0xff]  }
  0x5d   :  { %698 = vmatpush3.bf16.msra.mxu0 %v784_v43  ;;  %p892_p7 = por %p891_p6, %p890_p5 }
  0x5e   :  { %396 = vmatpush1.bf16.msra.mxu1 %v747_v17  ;;  %699 = vmatprep.subr.bf16.mxu0 %v785_v44  ;;  %v215_v17 = vld [vmem:[%s1064_s4] sm:$0x3] }
  0x5f   :  { %397 = vmatprep.subr.bf16.mxu1 %v748_v18  ;;  %v220_v18 = vrot.slane %v215_v17, %v94_v52  ;;  %p893_p8 = pnand %p892_p7, %p886_p4 }
  0x61   :  { %700 = vmatpush3.bf16.msra.mxu0 %v786_v45 }
  0x62   :  { %398 = vmatpush1.bf16.msra.mxu1 %v750_v19  ;;  %701 = vmatprep.subr.bf16.mxu0 %v787_v46  ;;  %v224_v19 = vrot.slane %v215_v17, %v98_v54 }
  0x63   :  { %399 = vmatprep.subr.bf16.mxu1 %v751_v20 }
  0x65   :  { %702 = vmatpush3.bf16.msra.mxu0 %v788_v47 }
  0x66   :  { %400 = vmatpush1.bf16.msra.mxu1 %v753_v21  ;;  %703 = vmatprep.subr.bf16.mxu0 %v789_v48 }
  0x67   :  { %401 = vmatprep.subr.bf16.mxu1 %v754_v22 }
  0x69   :  { %704 = vmatpush3.bf16.msra.mxu0 %v790_v49 }
  0x6a   :  { %402 = vmatpush1.bf16.msra.mxu1 %v756_v23  ;;  %705 = vmatprep.subr.bf16.mxu0 %v791_v11 }
  0x6b   :  { %403 = vmatprep.subr.bf16.mxu1 %v757_v24 }
  0x6d   :  { %706 = vmatpush3.bf16.msra.mxu0 %v792_v12 }
  0x6e   :  { %404 = vmatpush1.bf16.msra.mxu1 %v759_v25  ;;  %707 = vmatprep.subr.bf16.mxu0 %v793_v13 }
  0x6f   :  { %405 = vmatprep.subr.bf16.mxu1 %v760_v26 }
  0x71   :  { %708 = vmatpush3.bf16.msra.mxu0 %v794_v14 }
  0x72   :  { %406 = vmatpush1.bf16.msra.mxu1 %v762_v27  ;;  %709 = vmatprep.subr.bf16.mxu0 %v795_v15 }
  0x73   :  { %407 = vmatprep.subr.bf16.mxu1 %v763_v28 }
  0x75   :  { %710 = vmatpush3.bf16.msra.mxu0 %v796_v16 }
  0x76   :  { %408 = vmatpush1.bf16.msra.mxu1 %v765_v29 }
  0x77   :  { %409 = vmatprep.subr.bf16.mxu1 %v766_v30 }
  0x7a   :  { %410 = vmatpush1.bf16.msra.mxu1 %v768_v31 }
  0x7b   :  { %411 = vmatprep.subr.bf16.mxu1 %v769_v32 }
  0x7e   :  { %412 = vmatpush1.bf16.msra.mxu1 %v771_v33 }
  0x7f   :  { %413 = vmatprep.subr.bf16.mxu1 %v772_v34 }
  0x82   :  { %414 = vmatpush1.bf16.msra.mxu1 %v774_v35 }
  0x83   :  { %415 = vmatprep.subr.bf16.mxu1 %v775_v36 }
  0x86   :  { %416 = vmatpush1.bf16.msra.mxu1 %v777_v37 }
  0x87   :  { %417 = vmatprep.subr.bf16.mxu1 %v778_v38 }
  0x8a   :  { %418 = vmatpush1.bf16.msra.mxu1 %v780_v39  ;;  %v678_v39 = vld [vmem:[%s1066_s6] ss:$0 sm:$0xff] }
 0x126   :  { %v160_v57 = vpop.f32.mrb[0].mxu0 }
 0x127   :  { %v161_v58 = vadd.f32 %v160_v57, %v95_v55  ;;  %v162_v59 = vpop.f32.mrb[1].mxu0 }
 0x128   :  { %v163_v60 = vadd.f32 %v162_v59, %v99_v56  ;;  %v164_v61 = vpop.f32.mrb[2].mxu0 }
 0x129   :  { %v173_v62 = vmul.f32 0.2, %v161_v58  ;;  %v165_v63 = vadd.f32 %v164_v61, %v95_v55  ;;  %v166_v0 = vpop.f32.mrb[3].mxu0  ;;  %vm169_vm1 = vcmp.gt.f32.partialorder %v161_v58, 0.0 }
 0x12a   :  { %v174_v1 = vmul.f32 0.2, %v163_v60  ;;  %v167_v2 = vadd.f32 %v166_v0, %v99_v56  ;;  %vm170_vm3 = vcmp.gt.f32.partialorder %v163_v60, 0.0 }
 0x12b   :  { %vm171_vm2 = vcmp.gt.f32.partialorder %v165_v63, 0.0  ;;  %v175_v3 = vmul.f32 0.2, %v165_v63  ;;  %v177_v5 = vsel %vm169_vm1, %v161_v58, %v173_v62 }
 0x12c   :  { %v176_v4 = vmul.f32 0.2, %v167_v2  ;;  %vm172_vm4 = vcmp.gt.f32.partialorder %v167_v2, 0.0  ;;  %v178_v7 = vsel %vm170_vm3, %v163_v60, %v174_v1 }
 0x12d   :  { %v179_v6 = vsel %vm171_vm2, %v165_v63, %v175_v3 }
 0x12e   :  { %v180_v8 = vsel %vm172_vm4, %v167_v2, %v176_v4  ;;  %v181_v9 = vpack.c.bf16 %v179_v6, %v177_v5 }
 0x12f   :  { %v182_v10 = vpack.c.bf16 %v180_v8, %v178_v7 }
 0x131   :  { %419 = vmatprep.mubr.bf16.mxu1 %v182_v10 }
 0x132   :  { %420 = vmatmul.mubr.bf16.vlgmr.msra.gmra.mrb[0].mxu1 %v181_v9 }
 0x205   :  { %v421_v20 = vpop.f32.mrb[0].mxu1 }
 0x206   :  { %v422_v21 = vadd.f32 %v421_v20, %v220_v18  ;;  %v423_v22 = vpop.f32.mrb[1].mxu1 }
 0x207   :  { %v424_v23 = vadd.f32 %v423_v22, %v224_v19  ;;  %v425_v24 = vpop.f32.mrb[2].mxu1 }
 0x208   :  { %v434_v25 = vmul.f32 0.2, %v422_v21  ;;  %v426_v26 = vadd.f32 %v425_v24, %v220_v18  ;;  %v427_v27 = vpop.f32.mrb[3].mxu1  ;;  %vm430_vm5 = vcmp.gt.f32.partialorder %v422_v21, 0.0 }
 0x209   :  { %v435_v28 = vmul.f32 0.2, %v424_v23  ;;  %v428_v29 = vadd.f32 %v427_v27, %v224_v19  ;;  %vm431_vm6 = vcmp.gt.f32.partialorder %v424_v23, 0.0 }
 0x20a   :  { %vm432_vm7 = vcmp.gt.f32.partialorder %v426_v26, 0.0  ;;  %v436_v30 = vmul.f32 0.2, %v426_v26  ;;  %v438_v32 = vsel %vm430_vm5, %v422_v21, %v434_v25 }
 0x20b   :  { %vm433_vm8 = vcmp.gt.f32.partialorder %v428_v29, 0.0  ;;  %v437_v31 = vmul.f32 0.2, %v428_v29  ;;  %v439_v35 = vsel %vm431_vm6, %v424_v23, %v435_v28 }
 0x20c   :  { %v440_v33 = vsel %vm432_vm7, %v426_v26, %v436_v30 }
 0x20d   :  { %v442_v34 = vpack.c.bf16 %v440_v33, %v438_v32  ;;  %v441_v36 = vsel %vm433_vm8, %v428_v29, %v437_v31 }
 0x20e   :  { %v443_v37 = vpack.c.bf16 %v441_v36, %v439_v35 }
 0x210   :  { %611 = vmatprep.mubr.bf16.mxu0 %v443_v37 }
 0x211   :  { %612 = vmatmul.mubr.bf16.vlgmr.msra.gmra.mrb[4].mxu0 %v442_v34 }
 0x2e4   :  { %v711_v38 = vpop.f32.mrb[4].mxu0 }
 0x2e5   :  { %v712_v40 = vpop.f32.mrb[5].mxu0 }
 0x2e6   :  { %v713_v41 = vadd.f32 %v712_v40, %v711_v38  ;;  %v714_v42 = vpop.f32.mrb[6].mxu0 }
 0x2e7   :  { %v715_v43 = vpop.f32.mrb[7].mxu0 }
 0x2e8   :  { %v614_v44 = vadd.f32 %v713_v41, %v678_v39  ;;  %v716_v45 = vadd.f32 %v715_v43, %v714_v42 }
 0x2ea   :  { %620 = vst [vmem:[#allocation10] sm:$0xff] %v614_v44  ;;  %v617_v46 = vadd.f32 %v716_v45, %v678_v39 }
 0x2ec   :  { %621 = vst [vmem:[#allocation10 + $0x8] sm:$0xff] %v617_v46 }
 0x2ed   :  { %896 = shalt.err (!%p893_p8)
}
 0x2ee   :  { %s897_s15 = scalar_lea.hbm %s1067_s7, 256 }
 0x2ef   :  { %p898_p9 = scmp.ne.s32.totalorder %s1067_s7, %s897_s15  ;;  %p901_p10 = scmp.lt.u32.totalorder %s897_s15, %s1067_s7 }
 0x2f1   :  { %p903_p11 = pnand %p901_p10, %p898_p9 }
 0x2f3   :  { %906 = shalt.err (!%p903_p11)
}
 0x2f4   :  { %633 = dma.vmem_to_hbm [thread:$0]  %s628_s10, 256, %s1067_s7, [#allocation4], %s917_s13, %s917_s13, %s918_s14  }
 0x2f5   :  { %913 = dma.done.wait [#allocation4], 256  }
 0x2f6   :  { %914 = vsyncadd [#allocation4], 4294967040 }
 0x2f7   :  { %637 = vsyncpa [#allocation3], 1 }
 0x2f8   :  { %638 = vsyncpa [#allocation6], 1 }
 0x2f9   :  { %639 = vsyncpa [#allocation9], 1 }
 0x2fa   :  { %640 = vsyncpa [#allocation4], 1 }

</bundles_post_ra>
